<compile_context>
chip_gen: v7x
topology: tpu7x:2x2x1
jax: 0.10.0
libtpu: 0.0.40
codegen_flags: <defaults>
</compile_context>

<pallas_src>
import numpy as np

import jax
import jax.numpy as jnp
from jax import lax
from jax.experimental import pallas as pl
from jax.experimental.pallas import tpu as pltpu

# ---------------- model hyper-parameters (small, deterministic) ----------------
B = 2             # batch
C_IN = 3          # image channels
IMG = 16          # image H = W
PATCH = 4         # encoder.patch_size
D_MODEL = 128     # encoder embedding dim (lane-native: feats stores are unmasked)
N_CLS = 4         # n_cls
GRID = 16         # grd (grid_size) -> output mask spatial size

HP = IMG // PATCH           # patch-grid height
WP = IMG // PATCH           # patch-grid width
N_TOK = HP * WP             # tokens per image
HD = GRID // PATCH          # decoder patch-grid height (== HP here)
WD = GRID // PATCH          # decoder patch-grid width
K_PATCH = C_IN * PATCH * PATCH   # flattened patch length
LN_EPS = 1e-6               # timm-ViT LayerNorm eps


# ---------------- fused Pallas kernel ----------------
def segmenter_kernel(p_ref, we_ref, ln_ref, dec_ref, kt_ref,
                     feats_ref, masks_ref, lt_sc):
    """Fused: patch-embed + LayerNorm -> linear class head -> bilinear upsample.

    p_ref    : (B*N, K)        bf16 flattened patches
    we_ref   : (K, D)          bf16 patch-embed weight
    ln_ref   : (3, D)          f32  rows = [b_embed, gamma, beta]
    dec_ref  : (n_cls, D+1)    bf16 [w_dec^T | b_dec]
    kt_ref   : (N, H*W)        bf16 kron(A_h, A_w)^T bilinear matrix
    feats_ref: (B*N, D)        f32  encoder features output (lane-dense, D=128)
    masks_ref: (B*n_cls, H*W)  f32  upsampled masks (lane-dense, H*W=256)
    lt_sc    : (B*n_cls, N)    f32  VMEM scratch staging per-batch class logits
    """
    # ---- encoder: patch embedding (bf16 MXU, f32 accumulate) + f32 LayerNorm ----
    x = jnp.dot(p_ref[...], we_ref[...], preferred_element_type=jnp.float32)  # (B*N, D)
    x = x + ln_ref[0:1, :]                                   # + b_embed
    mu = jnp.mean(x, axis=-1, keepdims=True)
    var = jnp.mean((x - mu) ** 2, axis=-1, keepdims=True)
    feats = (x - mu) * lax.rsqrt(var + LN_EPS) * ln_ref[1:2, :] + ln_ref[2:3, :]

    # Lane-dense store: (B*N, 128) f32 -> full unmasked vreg stores.
    feats_ref[...] = feats

    # ---- decoder linear head, feats stay in VMEM ----
    wdt = dec_ref[:, 0:D_MODEL]                              # (n_cls, D) bf16
    bd = dec_ref[:, D_MODEL:D_MODEL + 1].astype(jnp.float32)  # (n_cls, 1) f32
    for b in range(B):  # static, B = 2
        # Sublane slice at a multiple of 8 (tile-aligned); transposed-operand matmul
        # contracts on D so no explicit transpose of feats/logits is materialized.
        fb = feats[b * N_TOK:(b + 1) * N_TOK, :].astype(jnp.bfloat16)   # (N, D)
        lt_b = lax.dot_general(                                          # (n_cls, N)
            wdt, fb,
            dimension_numbers=(((1,), (1,)), ((), ())),
            preferred_element_type=jnp.float32) + bd
        # Stage into scratch so the masks output gets ONE aligned 8-row store.
        lt_sc[b * N_CLS:(b + 1) * N_CLS, :] = lt_b

    # ---- bilinear upsample: one matmul for BOTH batches, one aligned store ----
    masks_ref[...] = jnp.dot(lt_sc[...].astype(jnp.bfloat16), kt_ref[...],
                             preferred_element_type=jnp.float32)        # (B*n_cls, H*W)


# ---------------- host-side interpolation-matrix setup ----------------
def bilinear_matrix(out_size, in_size):
    """PyTorch F.interpolate(mode='bilinear', align_corners=False) as an (out, in) matrix."""
    scale = in_size / out_size
    i = np.arange(out_size)
    src = (i + 0.5) * scale - 0.5
    src = np.clip(src, 0.0, None)
    i0 = np.minimum(np.floor(src).astype(np.int64), in_size - 1)
    i1 = np.minimum(i0 + 1, in_size - 1)
    frac = np.clip(src - i0, 0.0, 1.0)
    A = np.zeros((out_size, in_size), np.float32)
    A[i, i0] += (1.0 - frac).astype(np.float32)
    A[i, i1] += frac.astype(np.float32)
    return A


def make_params(k_w, k_wd):
    """Packed, bf16-cast parameters (host side, once).  5 kernel inputs total."""
    w_embed = 0.02 * jax.random.normal(k_w, (K_PATCH, D_MODEL), jnp.float32)
    b_embed = jnp.linspace(-0.01, 0.01, D_MODEL, dtype=jnp.float32)
    gamma = jnp.ones((D_MODEL,), jnp.float32)
    beta = jnp.zeros((D_MODEL,), jnp.float32)
    w_dec = 0.02 * jax.random.normal(k_wd, (D_MODEL, N_CLS), jnp.float32)
    b_dec = jnp.linspace(-0.05, 0.05, N_CLS, dtype=jnp.float32)
    a_h = bilinear_matrix(GRID, HD)
    a_w = bilinear_matrix(GRID, WD)
    kron_t = np.kron(a_h, a_w).T.astype(np.float32)          # (N, H*W); entries exact in bf16
    return dict(
        w_embed=w_embed.astype(jnp.bfloat16),                                   # (K, D)
        ln=jnp.stack([b_embed, gamma, beta], axis=0),                           # (3, D) f32
        dec=jnp.concatenate([w_dec.T, b_dec[:, None]], axis=1).astype(jnp.bfloat16),  # (n_cls, D+1)
        kron_t=jnp.asarray(kron_t, jnp.bfloat16),                               # (N, H*W)
    )


# ---------------- forward wrapper (glue reshapes are fused by jit) ----------------
def _segmenter2_forward(im, params):
    """Mirrors Segmenter2.forward: returns (masks, x2)."""
    Bn, C, Him, Wim = im.shape
    hp, wp = Him // PATCH, Wim // PATCH
    n = hp * wp

    # Patch extraction (same flattening order as a Conv2d patch embed).
    # TODO(synk): for production image sizes, fold this gather into the kernel via a
    # grid over (b, hp) with BlockSpec index_maps over image blocks.
    patches = im.reshape(Bn, C, hp, PATCH, wp, PATCH)
    patches = patches.transpose(0, 2, 4, 1, 3, 5).reshape(Bn * n, C * PATCH * PATCH)
    patches = patches.astype(jnp.bfloat16)

    feats, masks_flat = pl.pallas_call(
        segmenter_kernel,
        out_shape=(
            jax.ShapeDtypeStruct((Bn * n, D_MODEL), jnp.float32),          # feats (lane-dense)
            jax.ShapeDtypeStruct((Bn * N_CLS, GRID * GRID), jnp.float32),  # masks (lane-dense)
        ),
        scratch_shapes=[pltpu.VMEM((Bn * N_CLS, n), jnp.float32)],
    )(patches, params["w_embed"], params["ln"], params["dec"], params["kron_t"])

    # x2 = reshape(x, (B, sqrt(N), sqrt(N), D)) — free row-major view.
    x2 = feats.reshape(Bn, hp, wp, D_MODEL)
    # masks: free row-major view of the lane-dense kernel output.
    masks = masks_flat.reshape(Bn, N_CLS, GRID, GRID)
    return masks, x2


segmenter2_forward = jax.jit(_segmenter2_forward)


# ---------------- pure-numpy reference (for correctness check) ----------------
def reference_forward(im_np, params):
    w_e = np.asarray(params["w_embed"].astype(jnp.float32))
    ln = np.asarray(params["ln"])
    dec = np.asarray(params["dec"].astype(jnp.float32))
    b_e, g, bt = ln[0], ln[1], ln[2]
    w_dec_t, b_dec = dec[:, :D_MODEL], dec[:, D_MODEL]

    patches = im_np.reshape(B, C_IN, HP, PATCH, WP, PATCH)
    patches = patches.transpose(0, 2, 4, 1, 3, 5).reshape(B * N_TOK, K_PATCH)
    x = patches @ w_e + b_e
    mu = x.mean(-1, keepdims=True)
    var = ((x - mu) ** 2).mean(-1, keepdims=True)
    feats = (x - mu) / np.sqrt(var + LN_EPS) * g + bt
    logits = feats @ w_dec_t.T + b_dec                                   # (B*N, n_cls)
    masks_p = logits.reshape(B, HD, WD, N_CLS).transpose(0, 3, 1, 2)
    a_h = bilinear_matrix(GRID, HD)
    a_w = bilinear_matrix(GRID, WD)
    masks = np.einsum("yh,bchw,xw->bcyx", a_h, masks_p, a_w)
    x2 = feats.reshape(B, HP, WP, D_MODEL)
    return masks.astype(np.float32), x2.astype(np.float32)


if __name__ == "__main__":
    key = jax.random.PRNGKey(0)
    k_im, k_w, k_wd = jax.random.split(key, 3)

    # Round the image to bf16-representable values so the in-kernel bf16 cast is
    # lossless and the f32 numpy reference sees exactly the same numbers.
    im = jax.random.normal(k_im, (B, C_IN, IMG, IMG), jnp.float32)
    im = im.astype(jnp.bfloat16).astype(jnp.float32)

    params = make_params(k_w, k_wd)

    masks, x2 = segmenter2_forward(im, params)
    jax.block_until_ready(masks)
    jax.block_until_ready(x2)

    assert masks.shape == (B, N_CLS, GRID, GRID) and masks.dtype == jnp.float32
    assert x2.shape == (B, HP, WP, D_MODEL)
    assert bool(jnp.all(jnp.isfinite(masks))) and bool(jnp.all(jnp.isfinite(x2)))

    # Numerical check against a pure-numpy reference using the same (bf16-rounded) values.
    m_ref, x2_ref = reference_forward(np.asarray(im), params)
    np.testing.assert_allclose(np.asarray(masks), m_ref, rtol=5e-3, atol=5e-3)
    np.testing.assert_allclose(np.asarray(x2), x2_ref, rtol=5e-3, atol=5e-3)

    print("KERNEL_OK")
</pallas_src>

<mosaic_0001>
module attributes {stable_mosaic.version = 11 : i64} {
  func.func @segmenter_kernel(%arg0: memref<32x48xbf16, #tpu.memory_space<vmem>>, %arg1: memref<48x128xbf16, #tpu.memory_space<vmem>>, %arg2: memref<3x128xf32, #tpu.memory_space<vmem>>, %arg3: memref<4x129xbf16, #tpu.memory_space<vmem>>, %arg4: memref<16x256xbf16, #tpu.memory_space<vmem>>, %arg5: memref<32x128xf32, #tpu.memory_space<vmem>>, %arg6: memref<8x256xf32, #tpu.memory_space<vmem>>, %arg7: memref<8x16xf32, #tpu.memory_space<vmem>>) attributes {dimension_semantics = [], scalar_prefetch = 0 : i64, scratch_operands = 1 : i64, tpu.core_type = #tpu.core_type<tc>} {
    %c0 = arith.constant 0 : index
    %c0_0 = arith.constant 0 : index
    %0 = vector.load %arg0[%c0, %c0_0] : memref<32x48xbf16, #tpu.memory_space<vmem>>, vector<32x48xbf16>
    %c0_1 = arith.constant 0 : index
    %c0_2 = arith.constant 0 : index
    %1 = vector.load %arg1[%c0_1, %c0_2] : memref<48x128xbf16, #tpu.memory_space<vmem>>, vector<48x128xbf16>
    %cst = arith.constant dense<0.000000e+00> : vector<32x128xf32>
    %2 = tpu.matmul %0, %1, %cst {dimension_numbers = #tpu.dot_dimension_numbers<[1], [0], [0], [1], [0, 0, 1, 1], [], []>} : vector<32x48xbf16>, vector<48x128xbf16>, vector<32x128xf32> -> vector<32x128xf32>
    %c0_3 = arith.constant 0 : index
    %c0_4 = arith.constant 0 : index
    %3 = vector.load %arg2[%c0_3, %c0_4] : memref<3x128xf32, #tpu.memory_space<vmem>>, vector<1x128xf32>
    %4 = vector.broadcast %3 : vector<1x128xf32> to vector<32x128xf32>
    %5 = arith.addf %2, %4 : vector<32x128xf32>
    %cst_5 = arith.constant dense<0.000000e+00> : vector<32xf32>
    %6 = vector.multi_reduction <add>, %5, %cst_5 [1] : vector<32x128xf32> to vector<32xf32>
    %7 = vector.shape_cast %6 : vector<32xf32> to vector<32x1xf32>
    %cst_6 = arith.constant 1.280000e+02 : f32
    %8 = vector.broadcast %cst_6 : f32 to vector<32x1xf32>
    %9 = arith.divf %7, %8 : vector<32x1xf32>
    %10 = vector.broadcast %9 : vector<32x1xf32> to vector<32x128xf32>
    %11 = arith.subf %5, %10 : vector<32x128xf32>
    %12 = arith.mulf %11, %11 : vector<32x128xf32>
    %cst_7 = arith.constant dense<0.000000e+00> : vector<32xf32>
    %13 = vector.multi_reduction <add>, %12, %cst_7 [1] : vector<32x128xf32> to vector<32xf32>
    %14 = vector.shape_cast %13 : vector<32xf32> to vector<32x1xf32>
    %cst_8 = arith.constant 1.280000e+02 : f32
    %15 = vector.broadcast %cst_8 : f32 to vector<32x1xf32>
    %16 = arith.divf %14, %15 : vector<32x1xf32>
    %17 = vector.broadcast %9 : vector<32x1xf32> to vector<32x128xf32>
    %18 = arith.subf %5, %17 : vector<32x128xf32>
    %cst_9 = arith.constant 9.99999997E-7 : f32
    %19 = vector.broadcast %cst_9 : f32 to vector<32x1xf32>
    %20 = arith.addf %16, %19 : vector<32x1xf32>
    %21 = math.rsqrt %20 : vector<32x1xf32>
    %22 = vector.broadcast %21 : vector<32x1xf32> to vector<32x128xf32>
    %23 = arith.mulf %18, %22 : vector<32x128xf32>
    %c1 = arith.constant 1 : index
    %c0_10 = arith.constant 0 : index
    %24 = vector.load %arg2[%c1, %c0_10] : memref<3x128xf32, #tpu.memory_space<vmem>>, vector<1x128xf32>
    %25 = vector.broadcast %24 : vector<1x128xf32> to vector<32x128xf32>
    %26 = arith.mulf %23, %25 : vector<32x128xf32>
    %c2 = arith.constant 2 : index
    %c0_11 = arith.constant 0 : index
    %27 = vector.load %arg2[%c2, %c0_11] : memref<3x128xf32, #tpu.memory_space<vmem>>, vector<1x128xf32>
    %28 = vector.broadcast %27 : vector<1x128xf32> to vector<32x128xf32>
    %29 = arith.addf %26, %28 : vector<32x128xf32>
    %c0_12 = arith.constant 0 : index
    %c0_13 = arith.constant 0 : index
    %30 = vector.load %arg5[%c0_12, %c0_13] : memref<32x128xf32, #tpu.memory_space<vmem>>, vector<32x128xf32>
    tpu.vector_store %arg5[%c0_12, %c0_13], %29 {strides = array<i32>} : memref<32x128xf32, #tpu.memory_space<vmem>>, vector<32x128xf32>,
    %c0_14 = arith.constant 0 : index
    %c0_15 = arith.constant 0 : index
    %31 = vector.load %arg3[%c0_14, %c0_15] : memref<4x129xbf16, #tpu.memory_space<vmem>>, vector<4x128xbf16>
    %c0_16 = arith.constant 0 : index
    %c128 = arith.constant 128 : index
    %32 = vector.load %arg3[%c0_16, %c128] : memref<4x129xbf16, #tpu.memory_space<vmem>>, vector<4x1xbf16>
    %33 = arith.extf %32 : vector<4x1xbf16> to vector<4x1xf32>
    %34 = vector.extract_strided_slice %29 {offsets = [0, 0], sizes = [16, 128], strides = [1, 1]} : vector<32x128xf32> to vector<16x128xf32>
    %35 = arith.truncf %34 : vector<16x128xf32> to vector<16x128xbf16>
    %cst_17 = arith.constant dense<0.000000e+00> : vector<4x16xf32>
    %36 = tpu.matmul %31, %35, %cst_17 {dimension_numbers = #tpu.dot_dimension_numbers<[1], [1], [0], [0], [0, 0, 1, 0], [], []>} : vector<4x128xbf16>, vector<16x128xbf16>, vector<4x16xf32> -> vector<4x16xf32>
    %37 = vector.broadcast %33 : vector<4x1xf32> to vector<4x16xf32>
    %38 = arith.addf %36, %37 : vector<4x16xf32>
    %c0_18 = arith.constant 0 : index
    %c0_19 = arith.constant 0 : index
    %39 = vector.load %arg7[%c0_18, %c0_19] : memref<8x16xf32, #tpu.memory_space<vmem>>, vector<4x16xf32>
    tpu.vector_store %arg7[%c0_18, %c0_19], %38 {strides = array<i32>} : memref<8x16xf32, #tpu.memory_space<vmem>>, vector<4x16xf32>,
    %40 = vector.extract_strided_slice %29 {offsets = [16, 0], sizes = [16, 128], strides = [1, 1]} : vector<32x128xf32> to vector<16x128xf32>
    %41 = arith.truncf %40 : vector<16x128xf32> to vector<16x128xbf16>
    %cst_20 = arith.constant dense<0.000000e+00> : vector<4x16xf32>
    %42 = tpu.matmul %31, %41, %cst_20 {dimension_numbers = #tpu.dot_dimension_numbers<[1], [1], [0], [0], [0, 0, 1, 0], [], []>} : vector<4x128xbf16>, vector<16x128xbf16>, vector<4x16xf32> -> vector<4x16xf32>
    %43 = vector.broadcast %33 : vector<4x1xf32> to vector<4x16xf32>
    %44 = arith.addf %42, %43 : vector<4x16xf32>
    %c4 = arith.constant 4 : index
    %c0_21 = arith.constant 0 : index
    %45 = vector.load %arg7[%c4, %c0_21] : memref<8x16xf32, #tpu.memory_space<vmem>>, vector<4x16xf32>
    tpu.vector_store %arg7[%c4, %c0_21], %44 {strides = array<i32>} : memref<8x16xf32, #tpu.memory_space<vmem>>, vector<4x16xf32>,
    %c0_22 = arith.constant 0 : index
    %c0_23 = arith.constant 0 : index
    %46 = vector.load %arg7[%c0_22, %c0_23] : memref<8x16xf32, #tpu.memory_space<vmem>>, vector<8x16xf32>
    %47 = arith.truncf %46 : vector<8x16xf32> to vector<8x16xbf16>
    %c0_24 = arith.constant 0 : index
    %c0_25 = arith.constant 0 : index
    %48 = vector.load %arg4[%c0_24, %c0_25] : memref<16x256xbf16, #tpu.memory_space<vmem>>, vector<16x256xbf16>
    %cst_26 = arith.constant dense<0.000000e+00> : vector<8x256xf32>
    %49 = tpu.matmul %47, %48, %cst_26 {dimension_numbers = #tpu.dot_dimension_numbers<[1], [0], [0], [1], [0, 0, 1, 1], [], []>} : vector<8x16xbf16>, vector<16x256xbf16>, vector<8x256xf32> -> vector<8x256xf32>
    %c0_27 = arith.constant 0 : index
    %c0_28 = arith.constant 0 : index
    %50 = vector.load %arg6[%c0_27, %c0_28] : memref<8x256xf32, #tpu.memory_space<vmem>>, vector<8x256xf32>
    tpu.vector_store %arg6[%c0_27, %c0_28], %49 {strides = array<i32>} : memref<8x256xf32, #tpu.memory_space<vmem>>, vector<8x256xf32>,
    return
  }
}

</mosaic_0001>

<bundles_post_ra>
// kernel: _segmenter2_forward.1
= control target key start
LH: loop header
LB: loop body
LE: loop exit
PB: predicated region body
PF: predicated region fallthrough
CT: control target
= control target key end

     0   :  { %vm67_vm0 = vcmask 392192   ;;  %s561_s0 = inlined_call_operand.vmem [shape: bf16[32,48], index: 0, kind: input, shape index: {}]   ;;  %s562_s1 = inlined_call_operand.vmem [shape: bf16[48,128], index: 1, kind: input, shape index: {}]   ;;  %s563_s2 = inlined_call_operand.vmem [shape: f32[3,128], index: 2, kind: input, shape index: {}]   ;;  %s564_s3 = inlined_call_operand.vmem [shape: bf16[4,129], index: 3, kind: input, shape index: {}]   ;;  %s565_s4 = inlined_call_operand.vmem [shape: bf16[16,256], index: 4, kind: input, shape index: {}]   ;;  %s566_s5 = inlined_call_operand.hbm [shape: f32[32,128], index: 5, kind: output, shape index: {0}]   ;;  %s567_s6 = inlined_call_operand.vmem [shape: f32[8,256], index: 6, kind: output, shape index: {1}]  }
   0x1   :  { %v423_v0 = vld [vmem:[%s562_s1] sm:$0xff]   ;;  %v424_v1 = vld [vmem:[%s562_s1 + $0x8] sm:$0xff]   ;;  %v425_v3 = vld [vmem:[%s562_s1 + $0x10] sm:$0xff]  }
   0x2   :  { %393 = vmatprep.subr.bf16.mxu0 %v423_v0  ;;  %v426_v2 = vld [vmem:[%s561_s0] sm:$0xff]  }
   0x3   :  { %394 = vmatpush3.bf16.msra.mxu0 %v423_v0  ;;  %399 = vmatprep.mubr.msk.bf16.mxu0 %vm67_vm0, %v426_v2 }
   0x4   :  { %395 = vmatprep.subr.bf16.mxu0 %v424_v1 }
   0x5   :  { %12 = vsyncpa [#allocation4], 0  ;;  %v427_v4 = vld [vmem:[%s561_s0 + $0x8] sm:$0xff]   ;;  %v371_v5 = vld [vmem:[%s563_s2] ss:$0 sm:$0xff]  ;;  %v463_v30 = vmov 0.0  }
   0x6   :  { %403 = vmatprep.subr.bf16.mxu1 %v463_v30  ;;  %vm464_vm1 = vmmov 0   ;;  %v191_v31 = vld [vmem:[%s564_s3 + $0x2] sm:$0x3]  ;;  %v465_v32 = vmov 0   ;;  %v379_v47 = vld [vmem:[%s563_s2 + $0x1] ss:$0 sm:$0xff] }
   0x7   :  { %396 = vmatpush3.bf16.msra.mxu0 %v424_v1  ;;  %405 = vmatprep.mubr.msk.bf16.mxu1 %vm464_vm1, %v463_v30  ;;  %v192_v33 = vunpack.c.l.bf16 %v191_v31  ;;  %v380_v49 = vld [vmem:[%s563_s2 + $0x2] ss:$0 sm:$0xff]  ;;  %v190_v1 = vld [vmem:[%s564_s3] sm:$0x3]  ;;  %vm246_vm2 = vcmask 125952   ;;  %vm304_vm3 = vcmask 130048  }
   0x8   :  { %397 = vmatprep.subr.bf16.mxu0 %v425_v3  ;;  %422 = vset.pattern.permute.xlu0 %v465_v32  ;;  %s467_s3 = smov [#allocation3]  }
   0xb   :  { %398 = vmatpush3.bf16.msra.mxu0 %v425_v3  ;;  %v428_v3 = vld [vmem:[%s565_s4] ss:$8 sps:$4 sm:$0xff]  }
   0xe   :  { %400 = vmatmul.mubr.msk.bf16.vlgmr.msra.gmra.mrb[0].mxu0 %vm67_vm0, %v427_v4  ;;  %v430_v4 = vld [vmem:[%s565_s4 + $0x4] ss:$8 sps:$4 sm:$0xff]   ;;  %s356_s4 = sshll.u32 %s467_s3, 4  ;;  %s357_s4 = int_to_ptr.vmem [resolvable:$true] %s356_s4 }
   0xf   :  { %340 = vmatprep.mubr.bf16.mxu0 %v465_v32  ;;  %308 = vmatprep.subr.bf16.mxu0 %v430_v4  ;;  %s439_s18 = scalar_lea.vmem %s357_s4, 512  ;;  %p444_p1 = scmp.lt.s32.totalorder %s357_s4, %s357_s4 }
  0x10   :  { %309 = vmatpush1.bf16.msra.mxu0 %v428_v3  ;;  %p440_p0 = scmp.ne.s32.totalorder %s357_s4, %s439_s18  ;;  %p445_p2 = scmp.lt.s32.totalorder %s439_s18, %s439_s18 }
  0x12   :  { %p446_p3 = por %p445_p2, %p444_p1 }
  0x14   :  { %p447_p4 = pnand %p446_p3, %p440_p0 }
  0xe1   :  { %v401_v6 = vpop.f32.mrb[0].mxu0 }
  0xe2   :  { %v117_v7 = vadd.f32 %v401_v6, %v371_v5  ;;  %v108_v8 = vpop.f32.mrb[1].mxu0 }
  0xe3   :  { %v109_v9 = vadd.f32 %v371_v5, %v108_v8  ;;  %v402_v10 = vpop.f32.mrb[2].mxu0 }
  0xe4   :  { %127 = vadd.xlane.f32.xlu1 %v117_v7  ;;  %v111_v11 = vpop.f32.mrb[3].mxu0  ;;  %v120_v12 = vadd.f32 %v402_v10, %v371_v5 }
  0xe5   :  { %123 = vadd.xlane.f32.xlu0 %v109_v9  ;;  %v112_v13 = vadd.f32 %v371_v5, %v111_v11  ;;  %v466_v5 = vmov 839922192  }
  0xe6   :  { %v200_v6 = vunpack.c.l.s4 %v466_v5 }
  0xe8   :  { %129 = vadd.xlane.f32.xlu1 %v120_v12  ;;  %v201_v8 = vunpack.c.0.s8 %v200_v6 }
  0xe9   :  { %125 = vadd.xlane.f32.xlu0 %v112_v13 }
 0x171   :  { %v128_v14 = vpop.xlane.xlu1 %127 }
 0x172   :  { %v124_v15 = vpop.xlane.xlu0 %123  ;;  %v134_v16 = vmul.f32 0.0078125, %v128_v14 }
 0x173   :  { %v132_v17 = vmul.f32 0.0078125, %v124_v15 }
 0x174   :  { %v138_v21 = vsub.f32 %v117_v7, %v134_v16  ;;  %v202_v7 = vlaneseq }
 0x175   :  { %v136_v18 = vsub.f32 %v109_v9, %v132_v17  ;;  %v130_v19 = vpop.xlane.xlu1 %129 }
 0x176   :  { %v126_v20 = vpop.xlane.xlu0 %125  ;;  %v135_v22 = vmul.f32 0.0078125, %v130_v19  ;;  %v142_v27 = vmul.f32 %v138_v21, %v138_v21  ;;  %v203_v9 = vshrl.u32 %v202_v7, 7 }
 0x177   :  { %v133_v23 = vmul.f32 0.0078125, %v126_v20  ;;  %v140_v24 = vmul.f32 %v136_v18, %v136_v18 }
 0x178   :  { %v139_v26 = vsub.f32 %v120_v12, %v135_v22  ;;  %v204_v10 = vsub.s32 %v201_v8, %v203_v9 }
 0x179   :  { %v137_v25 = vsub.f32 %v112_v13, %v133_v23  ;;  %144 = vadd.xlane.f32.xlu0 %v140_v24 }
 0x17a   :  { %v143_v29 = vmul.f32 %v139_v26, %v139_v26 }
 0x17b   :  { %v141_v28 = vmul.f32 %v137_v25, %v137_v25 }
 0x17d   :  { %148 = vadd.xlane.f32.xlu0 %v142_v27  ;;  %146 = vadd.xlane.f32.xlu1 %v141_v28 }
 0x181   :  { %150 = vadd.xlane.f32.xlu1 %v143_v29 }
 0x193   :  { %196 = vperm.xlu0 %422, %v192_v33  }
 0x206   :  { %v145_v34 = vpop.xlane.xlu0 %144 }
 0x207   :  { %v152_v35 = vmul.f32 0.0078125, %v145_v34 }
 0x209   :  { %v156_v36 = vadd.f32 1e-06, %v152_v35 }
 0x20a   :  { %v147_v37 = vpop.xlane.xlu1 %146  ;;  %v149_v38 = vpop.xlane.xlu0 %148 }
 0x20b   :  { %431 = vrsqrt.f32 %v156_v36  ;;  %v153_v39 = vmul.f32 0.0078125, %v147_v37  ;;  %v154_v40 = vmul.f32 0.0078125, %v149_v38 }
 0x20d   :  { %v157_v41 = vadd.f32 1e-06, %v153_v39  ;;  %v158_v42 = vadd.f32 1e-06, %v154_v40 }
 0x20e   :  { %v151_v43 = vpop.xlane.xlu1 %150 }
 0x20f   :  { %433 = vrsqrt.f32 %v157_v41  ;;  %v155_v44 = vmul.f32 0.0078125, %v151_v43 }
 0x210   :  { %435 = vrsqrt.f32 %v158_v42 }
 0x211   :  { %v159_v45 = vadd.f32 1e-06, %v155_v44 }
 0x212   :  { %v197_v11 = vpop.permute.xlu0 %196 }
 0x213   :  { %437 = vrsqrt.f32 %v159_v45  ;;  %v205_v12 = vrot.slane %v197_v11, %v204_v10 }
 0x215   :  { %v432_v46 = vpop.eup %431 }
 0x216   :  { %v164_v48 = vmul.f32 %v432_v46, %v136_v18 }
 0x218   :  { %v173_v50 = vmul.f32 %v379_v47, %v164_v48 }
 0x219   :  { %v434_v51 = vpop.eup %433 }
 0x21a   :  { %v436_v52 = vpop.eup %435  ;;  %v165_v53 = vmul.f32 %v434_v51, %v137_v25  ;;  %v182_v54 = vadd.f32 %v380_v49, %v173_v50 }
 0x21b   :  { %v166_v55 = vmul.f32 %v436_v52, %v138_v21 }
 0x21c   :  { %v174_v56 = vmul.f32 %v379_v47, %v165_v53  ;;  %186 = vst [vmem:[#allocation3] sm:$0xff] %v182_v54 }
 0x21d   :  { %v438_v57 = vpop.eup %437  ;;  %v175_v58 = vmul.f32 %v379_v47, %v166_v55 }
 0x21e   :  { %v167_v59 = vmul.f32 %v438_v57, %v139_v26  ;;  %v183_v60 = vadd.f32 %v380_v49, %v174_v56 }
 0x21f   :  { %v184_v61 = vadd.f32 %v380_v49, %v175_v58 }
 0x220   :  { %187 = vst [vmem:[#allocation3 + $0x8] sm:$0xff] %v183_v60  ;;  %v193_v62 = vpack.c.bf16 %v183_v60, %v182_v54  ;;  %v176_v63 = vmul.f32 %v379_v47, %v167_v59 }
 0x221   :  { %188 = vst [vmem:[#allocation3 + $0x10] sm:$0xff] %v184_v61 }
 0x222   :  { %404 = vmatpush3.bf16.xpose.msra.mxu1 %v193_v62  ;;  %v185_v0 = vadd.f32 %v380_v49, %v176_v63 }
 0x223   :  { %409 = vmatprep.subr.bf16.mxu1 %v463_v30 }
 0x224   :  { %189 = vst [vmem:[#allocation3 + $0x18] sm:$0xff] %v185_v0  ;;  %v248_v2 = vpack.c.bf16 %v185_v0, %v184_v61 }
 0x229   :  { %406 = vmatmul.mubr.bf16.vlgmr.msra.gmra.mrb[0].mxu1 %v190_v1 }
 0x22a   :  { %410 = vmatpush3.bf16.xpose.msra.mxu1 %v248_v2  ;;  %411 = vmatprep.mubr.msk.bf16.mxu1 %vm464_vm1, %v463_v30 }
 0x231   :  { %412 = vmatmul.mubr.bf16.vlgmr.msra.gmra.mrb[4].mxu1 %v190_v1 }
 0x2fc   :  { %v240_v13 = vpop.f32.mrb[0].mxu1 }
 0x2fd   :  { %v241_v14 = vadd.f32 %v240_v13, %v205_v12  ;;  %v407_v15 = vpop.f32.mrb[1].mxu1 }
 0x2fe   :  { %v243_v16 = vpop.f32.mrb[2].mxu1 }
 0x2ff   :  { %247 = vst.msk [vmem:[#allocation2] sm:$0xf] %vm246_vm2, %v241_v14  ;;  %v408_v17 = vpop.f32.mrb[3].mxu1 }
 0x304   :  { %v283_v18 = vpop.f32.mrb[4].mxu1 }
 0x305   :  { %v284_v19 = vadd.f32 %v283_v18, %v205_v12  ;;  %v413_v20 = vpop.f32.mrb[5].mxu1 }
 0x306   :  { %v286_v21 = vpop.f32.mrb[6].mxu1 }
 0x307   :  { %289 = vst.msk [vmem:[#allocation2 + $0x4] sm:$0xf] %vm246_vm2, %v284_v19  ;;  %v414_v22 = vpop.f32.mrb[7].mxu1 }
 0x30e   :  { %v290_v23 = vld [vmem:[#allocation2] sm:$0xff] }
 0x30f   :  { %v291_v24 = vpack.c.bf16 %v290_v23, %v290_v23 }
 0x311   :  { %383 = vmatmul.mubr.msk.bf16.vlgmr.msra.gmra.mrb[4].mxu0 %vm304_vm3, %v291_v24 }
 0x312   :  { %450 = shalt.err (!%p447_p4)
}
 0x313   :  { %s451_s21 = scalar_lea.hbm %s566_s5, 512 }
 0x314   :  { %p452_p5 = scmp.ne.s32.totalorder %s566_s5, %s451_s21  ;;  %p455_p6 = scmp.lt.u32.totalorder %s451_s21, %s566_s5 }
 0x316   :  { %p457_p7 = pnand %p455_p6, %p452_p5 }
 0x318   :  { %460 = shalt.err (!%p457_p7)
}
 0x319   :  { %s468_s26 = smov 128   ;;  %s469_s27 = smov 8  }
 0x31a   :  { %362 = dma.vmem_to_hbm [thread:$0]  %s357_s4, 512, %s566_s5, [#allocation4], %s468_s26, %s468_s26, %s469_s27  }
 0x3e4   :  { %v342_v25 = vpop.f32.mrb[4].mxu0 }
 0x3e5   :  { %349 = vst [vmem:[%s567_s6] sm:$0xff] %v342_v25  ;;  %v344_v26 = vpop.f32.mrb[5].mxu0 }
 0x3e6   :  { %350 = vst [vmem:[%s567_s6 + $0x8] sm:$0xff] %v344_v26  ;;  %v346_v27 = vpop.f32.mrb[6].mxu0 }
 0x3e7   :  { %v347_v28 = vpop.f32.mrb[7].mxu0 }
 0x3e8   :  { %461 = dma.done.wait [#allocation4], 512  }
 0x3e9   :  { %462 = vsyncadd [#allocation4], 4294966784 }
 0x3ea   :  { %370 = vsyncpa [#allocation4], 1 }

</bundles_post_ra>
